<compile_context>
chip_gen: v7x
topology: tpu7x:2x2x1
jax: 0.10.0
libtpu: 0.0.40
codegen_flags: <defaults>
</compile_context>

<pallas_src>
import functools

import jax
import jax.numpy as jnp
from jax.experimental import pallas as pl
from jax.experimental.pallas import tpu as pltpu


def _num_tensorcores():
    """Best-effort TensorCore-per-chip count; falls back to 2 (always safe)."""
    try:
        info = pltpu.get_tpu_info()
        for attr in ("num_cores", "num_tensorcores", "tensorcore_count",
                     "cores_per_chip", "core_count"):
            v = getattr(info, attr, None)
            if isinstance(v, int) and 1 <= v <= 8:
                return v
    except Exception:
        pass
    return 2


_NC = _num_tensorcores()


def _round_up(x, m):
    return ((x + m - 1) // m) * m


def _cdiv(a, b):
    return -(-a // b)


def _class_loss_kernel(pred_ref, meta_ref, sum_out_ref, cnt_out_ref,
                       acc_ref, cnt_acc_ref):
    j = pl.program_id(1)

    # Init the per-core accumulators on the first reduction step.
    @pl.when(j == 0)
    def _():
        acc_ref[...] = jnp.zeros_like(acc_ref)
        cnt_acc_ref[...] = jnp.zeros_like(cnt_acc_ref)

    # Lane-dense (R, 128) slabs, one per class; cast to f32 in VMEM.
    p0 = pred_ref[0].astype(jnp.float32)
    p1 = pred_ref[1].astype(jnp.float32)
    p2 = pred_ref[2].astype(jnp.float32)
    meta = meta_ref[...]                      # (R, 128) int32: 0/1/2 cls, 3 = masked

    # Stable 3-way logsumexp with the max term folded out (exp(mx - mx) == 1):
    # 2 exps + 1 log1p per row instead of 3 exps + 1 log.
    mx = jnp.maximum(jnp.maximum(p0, p1), p2)
    mn = jnp.minimum(jnp.minimum(p0, p1), p2)
    mid = (p0 + p1 + p2) - mx - mn
    lse = jnp.log1p(jnp.exp(mid - mx) + jnp.exp(mn - mx))

    # Logit of the true class (value irrelevant for masked rows: wm == 0).
    p_sel = jnp.where(meta == 0, p0, jnp.where(meta == 1, p1, p2))
    # Class weight (2**cls) with the validity mask folded in.
    wm = jnp.where(meta == 0, 1.0,
         jnp.where(meta == 1, 2.0,
         jnp.where(meta == 2, 4.0, 0.0)))
    m = (meta < 3).astype(jnp.float32)

    loss = (mx + lse) - p_sel                 # -log_softmax(pred)[cls]

    # Fold (R, 128) partials into dense (8, 128) accumulators.  The reshape
    # only splits the leading (sublane-blocked) axis, so this is pure VPU adds
    # across vregs; the final cross-lane reduce happens outside the kernel.
    r = meta.shape[0]
    acc_ref[...] += jnp.sum((loss * wm).reshape(r // 8, 8, 128), axis=0)
    cnt_acc_ref[...] += jnp.sum(m.reshape(r // 8, 8, 128), axis=0)

    # Epilogue: hand this core's dense partials back (tiny 4 KiB blocks).
    @pl.when(j == pl.num_programs(1) - 1)
    def _():
        sum_out_ref[...] = acc_ref[...].reshape(sum_out_ref.shape)
        cnt_out_ref[...] = cnt_acc_ref[...].reshape(cnt_out_ref.shape)


@functools.partial(jax.jit, static_argnames=("max_rows_per_step",))
def class_loss(pred, label, have_label, max_rows_per_step=131072):
    """Equivalent of ClassLoss.forward(pred, label, have_label) -> (loss, {})."""
    p2 = pred.reshape(-1, 3)
    n = p2.shape[0]

    # Tile sizing: R 128-lane row-groups per grid step, R a multiple of 8.
    max_r = max(8, (max_rows_per_step // 128) // 8 * 8)
    m_needed = _cdiv(n, 128)
    r = min(max_r, _round_up(_cdiv(m_needed, _NC), 8))
    nblk = max(1, _cdiv(m_needed, _NC * r))
    m_total = _NC * nblk * r
    n_pad = m_total * 128

    # Class-major, lane-dense pred (3, M, 128) in its native dtype.
    # TODO(synk): accept pred already class-major (3, N) from the caller to
    # eliminate this wrapper transpose pass entirely.
    pred_t = jnp.pad(jnp.transpose(p2), ((0, 0), (0, n_pad - n)))
    pred_t = pred_t.reshape(3, m_total, 128)

    # Pack (class index, mask) into one int32 per row; 3 == "not selected".
    # Assumes strictly one-hot labels on valid rows (as the PyTorch code does).
    cls = jnp.argmax(label.reshape(-1, 3), axis=-1).astype(jnp.int32)
    valid = have_label.reshape(-1).astype(bool)
    meta = jnp.where(valid, cls, jnp.int32(3))
    meta = jnp.pad(meta, (0, n_pad - n), constant_values=3)
    meta = meta.reshape(m_total, 128)

    sums, cnts = pl.pallas_call(
        _class_loss_kernel,
        out_shape=(
            jax.ShapeDtypeStruct((_NC, 8, 128), jnp.float32),  # per-core loss partials
            jax.ShapeDtypeStruct((_NC, 8, 128), jnp.float32),  # per-core row counts
        ),
        grid_spec=pltpu.PrefetchScalarGridSpec(
            num_scalar_prefetch=0,
            grid=(_NC, nblk),
            in_specs=[
                pl.BlockSpec((3, r, 128), lambda c, j: (0, c * nblk + j, 0)),
                pl.BlockSpec((r, 128), lambda c, j: (c * nblk + j, 0)),
            ],
            out_specs=[
                pl.BlockSpec((1, 8, 128), lambda c, j: (c, 0, 0)),
                pl.BlockSpec((1, 8, 128), lambda c, j: (c, 0, 0)),
            ],
            scratch_shapes=[
                pltpu.VMEM((8, 128), jnp.float32),  # weighted-loss accumulator
                pltpu.VMEM((8, 128), jnp.float32),  # selected-row count accumulator
            ],
        ),
        compiler_params=pltpu.CompilerParams(
            dimension_semantics=("parallel", "arbitrary"),
        ),
    )(pred_t, meta)

    total = jnp.sum(sums)
    count = jnp.sum(cnts)
    return total / count, {}


def _reference(pred, label, have_label):
    p = pred.reshape(-1, 3).astype(jnp.float32)
    y = label.reshape(-1, 3).astype(jnp.float32)
    m = have_label.reshape(-1).astype(jnp.float32)
    logp = jax.nn.log_softmax(p, axis=-1)
    loss = -jnp.sum(y * logp, axis=-1)
    w = y[:, 0] * 1.0 + y[:, 1] * 2.0 + y[:, 2] * 4.0
    return jnp.sum(loss * w * m) / jnp.sum(m)


if __name__ == "__main__":
    key = jax.random.PRNGKey(0)
    k1, k2, k3 = jax.random.split(key, 3)

    # Small shapes: batch=2, seq=8, 3 classes -> N = 16 rows after .view(-1, 3)
    B, S = 2, 8
    pred = jax.random.normal(k1, (B, S, 3), dtype=jnp.float32)
    cls = jax.random.randint(k2, (B, S), 0, 3)
    label = jax.nn.one_hot(cls, 3, dtype=jnp.float32)
    have_label = jax.random.bernoulli(k3, 0.7, (B, S))
    # Guarantee at least one selected row (mirrors the PyTorch assumption that
    # the masked selection is non-empty).
    have_label = have_label.at[0, 0].set(True)

    loss, aux = class_loss(pred, label, have_label)
    loss = jax.block_until_ready(loss)

    ref = _reference(pred, label, have_label)
    assert jnp.allclose(loss, ref, rtol=1e-5, atol=1e-6), (loss, ref)
    assert aux == {}

    print("KERNEL_OK")
</pallas_src>

<mosaic_0001>
module attributes {stable_mosaic.version = 11 : i64} {
  func.func @_class_loss_kernel(%arg0: i32, %arg1: i32, %arg2: memref<3x8x128xf32, #tpu.memory_space<vmem>>, %arg3: memref<8x128xi32, #tpu.memory_space<vmem>>, %arg4: memref<1x8x128xf32, #tpu.memory_space<vmem>>, %arg5: memref<1x8x128xf32, #tpu.memory_space<vmem>>, %arg6: memref<8x128xf32, #tpu.memory_space<vmem>>, %arg7: memref<8x128xf32, #tpu.memory_space<vmem>>) attributes {dimension_semantics = [#tpu.dimension_semantics<parallel>, #tpu.dimension_semantics<arbitrary>], iteration_bounds = array<i64: 2, 1>, scalar_prefetch = 0 : i64, scratch_operands = 2 : i64, tpu.core_type = #tpu.core_type<tc>, window_params = [{transform_indices = @transform_0, window_bounds = array<i64: 3, 8, 128>}, {transform_indices = @transform_1, window_bounds = array<i64: 8, 128>}, {transform_indices = @transform_2, window_bounds = array<i64: 1, 8, 128>}, {transform_indices = @transform_3, window_bounds = array<i64: 1, 8, 128>}]} {
    %c0_i32 = arith.constant 0 : i32
    %0 = arith.cmpi eq, %arg1, %c0_i32 : i32
    %1 = arith.extui %0 : i1 to i32
    %c0_i32_0 = arith.constant 0 : i32
    %2 = arith.cmpi ne, %1, %c0_i32_0 : i32
    scf.if %2 {
      %cst_27 = arith.constant 0.000000e+00 : f32
      %63 = vector.broadcast %cst_27 : f32 to vector<8x128xf32>
      %c0_28 = arith.constant 0 : index
      %c0_29 = arith.constant 0 : index
      %64 = vector.load %arg6[%c0_28, %c0_29] : memref<8x128xf32, #tpu.memory_space<vmem>>, vector<8x128xf32>
      tpu.vector_store %arg6[%c0_28, %c0_29], %63 {strides = array<i32>} : memref<8x128xf32, #tpu.memory_space<vmem>>, vector<8x128xf32>,
      %cst_30 = arith.constant 0.000000e+00 : f32
      %65 = vector.broadcast %cst_30 : f32 to vector<8x128xf32>
      %c0_31 = arith.constant 0 : index
      %c0_32 = arith.constant 0 : index
      %66 = vector.load %arg7[%c0_31, %c0_32] : memref<8x128xf32, #tpu.memory_space<vmem>>, vector<8x128xf32>
      tpu.vector_store %arg7[%c0_31, %c0_32], %65 {strides = array<i32>} : memref<8x128xf32, #tpu.memory_space<vmem>>, vector<8x128xf32>,
    } else {
    }
    %c0 = arith.constant 0 : index
    %c0_1 = arith.constant 0 : index
    %c0_2 = arith.constant 0 : index
    %3 = vector.load %arg2[%c0, %c0_1, %c0_2] : memref<3x8x128xf32, #tpu.memory_space<vmem>>, vector<1x8x128xf32>
    %4 = vector.shape_cast %3 : vector<1x8x128xf32> to vector<8x128xf32>
    %c1 = arith.constant 1 : index
    %c0_3 = arith.constant 0 : index
    %c0_4 = arith.constant 0 : index
    %5 = vector.load %arg2[%c1, %c0_3, %c0_4] : memref<3x8x128xf32, #tpu.memory_space<vmem>>, vector<1x8x128xf32>
    %6 = vector.shape_cast %5 : vector<1x8x128xf32> to vector<8x128xf32>
    %c2 = arith.constant 2 : index
    %c0_5 = arith.constant 0 : index
    %c0_6 = arith.constant 0 : index
    %7 = vector.load %arg2[%c2, %c0_5, %c0_6] : memref<3x8x128xf32, #tpu.memory_space<vmem>>, vector<1x8x128xf32>
    %8 = vector.shape_cast %7 : vector<1x8x128xf32> to vector<8x128xf32>
    %c0_7 = arith.constant 0 : index
    %c0_8 = arith.constant 0 : index
    %9 = vector.load %arg3[%c0_7, %c0_8] : memref<8x128xi32, #tpu.memory_space<vmem>>, vector<8x128xi32>
    %10 = arith.maximumf %4, %6 : vector<8x128xf32>
    %11 = arith.maximumf %10, %8 : vector<8x128xf32>
    %12 = arith.minimumf %4, %6 : vector<8x128xf32>
    %13 = arith.minimumf %12, %8 : vector<8x128xf32>
    %14 = arith.addf %4, %6 : vector<8x128xf32>
    %15 = arith.addf %14, %8 : vector<8x128xf32>
    %16 = arith.subf %15, %11 : vector<8x128xf32>
    %17 = arith.subf %16, %13 : vector<8x128xf32>
    %18 = arith.subf %17, %11 : vector<8x128xf32>
    %19 = math.exp %18 : vector<8x128xf32>
    %20 = arith.subf %13, %11 : vector<8x128xf32>
    %21 = math.exp %20 : vector<8x128xf32>
    %22 = arith.addf %19, %21 : vector<8x128xf32>
    %23 = math.log1p %22 : vector<8x128xf32>
    %c0_i32_9 = arith.constant 0 : i32
    %24 = vector.broadcast %c0_i32_9 : i32 to vector<8x128xi32>
    %25 = arith.cmpi eq, %9, %24 : vector<8x128xi32>
    %c1_i32 = arith.constant 1 : i32
    %26 = vector.broadcast %c1_i32 : i32 to vector<8x128xi32>
    %27 = arith.cmpi eq, %9, %26 : vector<8x128xi32>
    %28 = arith.select %27, %6, %8 : vector<8x128xi1>, vector<8x128xf32>
    %29 = arith.select %25, %4, %28 : vector<8x128xi1>, vector<8x128xf32>
    %c0_i32_10 = arith.constant 0 : i32
    %30 = vector.broadcast %c0_i32_10 : i32 to vector<8x128xi32>
    %31 = arith.cmpi eq, %9, %30 : vector<8x128xi32>
    %c1_i32_11 = arith.constant 1 : i32
    %32 = vector.broadcast %c1_i32_11 : i32 to vector<8x128xi32>
    %33 = arith.cmpi eq, %9, %32 : vector<8x128xi32>
    %c2_i32 = arith.constant 2 : i32
    %34 = vector.broadcast %c2_i32 : i32 to vector<8x128xi32>
    %35 = arith.cmpi eq, %9, %34 : vector<8x128xi32>
    %cst = arith.constant 4.000000e+00 : f32
    %cst_12 = arith.constant 0.000000e+00 : f32
    %36 = vector.broadcast %cst : f32 to vector<8x128xf32>
    %37 = vector.broadcast %cst_12 : f32 to vector<8x128xf32>
    %38 = arith.select %35, %36, %37 : vector<8x128xi1>, vector<8x128xf32>
    %cst_13 = arith.constant 2.000000e+00 : f32
    %39 = vector.broadcast %cst_13 : f32 to vector<8x128xf32>
    %40 = arith.select %33, %39, %38 : vector<8x128xi1>, vector<8x128xf32>
    %cst_14 = arith.constant 1.000000e+00 : f32
    %41 = vector.broadcast %cst_14 : f32 to vector<8x128xf32>
    %42 = arith.select %31, %41, %40 : vector<8x128xi1>, vector<8x128xf32>
    %c3_i32 = arith.constant 3 : i32
    %43 = vector.broadcast %c3_i32 : i32 to vector<8x128xi32>
    %44 = arith.cmpi slt, %9, %43 : vector<8x128xi32>
    %45 = arith.extui %44 : vector<8x128xi1> to vector<8x128xi32>
    %46 = arith.sitofp %45 : vector<8x128xi32> to vector<8x128xf32>
    %47 = arith.addf %11, %23 : vector<8x128xf32>
    %48 = arith.subf %47, %29 : vector<8x128xf32>
    %c0_15 = arith.constant 0 : index
    %c0_16 = arith.constant 0 : index
    %49 = vector.load %arg6[%c0_15, %c0_16] : memref<8x128xf32, #tpu.memory_space<vmem>>, vector<8x128xf32>
    %50 = arith.mulf %48, %42 : vector<8x128xf32>
    %51 = vector.shape_cast %50 : vector<8x128xf32> to vector<1x8x128xf32>
    %cst_17 = arith.constant dense<0.000000e+00> : vector<8x128xf32>
    %52 = vector.multi_reduction <add>, %51, %cst_17 [0] : vector<1x8x128xf32> to vector<8x128xf32>
    %53 = arith.addf %49, %52 : vector<8x128xf32>
    %c0_18 = arith.constant 0 : index
    %c0_19 = arith.constant 0 : index
    %54 = vector.load %arg6[%c0_18, %c0_19] : memref<8x128xf32, #tpu.memory_space<vmem>>, vector<8x128xf32>
    tpu.vector_store %arg6[%c0_18, %c0_19], %53 {strides = array<i32>} : memref<8x128xf32, #tpu.memory_space<vmem>>, vector<8x128xf32>,
    %c0_20 = arith.constant 0 : index
    %c0_21 = arith.constant 0 : index
    %55 = vector.load %arg7[%c0_20, %c0_21] : memref<8x128xf32, #tpu.memory_space<vmem>>, vector<8x128xf32>
    %56 = vector.shape_cast %46 : vector<8x128xf32> to vector<1x8x128xf32>
    %cst_22 = arith.constant dense<0.000000e+00> : vector<8x128xf32>
    %57 = vector.multi_reduction <add>, %56, %cst_22 [0] : vector<1x8x128xf32> to vector<8x128xf32>
    %58 = arith.addf %55, %57 : vector<8x128xf32>
    %c0_23 = arith.constant 0 : index
    %c0_24 = arith.constant 0 : index
    %59 = vector.load %arg7[%c0_23, %c0_24] : memref<8x128xf32, #tpu.memory_space<vmem>>, vector<8x128xf32>
    tpu.vector_store %arg7[%c0_23, %c0_24], %58 {strides = array<i32>} : memref<8x128xf32, #tpu.memory_space<vmem>>, vector<8x128xf32>,
    %c0_i32_25 = arith.constant 0 : i32
    %60 = arith.cmpi eq, %arg1, %c0_i32_25 : i32
    %61 = arith.extui %60 : i1 to i32
    %c0_i32_26 = arith.constant 0 : i32
    %62 = arith.cmpi ne, %61, %c0_i32_26 : i32
    scf.if %62 {
      %c0_27 = arith.constant 0 : index
      %c0_28 = arith.constant 0 : index
      %63 = vector.load %arg6[%c0_27, %c0_28] : memref<8x128xf32, #tpu.memory_space<vmem>>, vector<8x128xf32>
      %64 = vector.shape_cast %63 : vector<8x128xf32> to vector<1x8x128xf32>
      %c0_29 = arith.constant 0 : index
      %c0_30 = arith.constant 0 : index
      %c0_31 = arith.constant 0 : index
      %65 = vector.load %arg4[%c0_29, %c0_30, %c0_31] : memref<1x8x128xf32, #tpu.memory_space<vmem>>, vector<1x8x128xf32>
      tpu.vector_store %arg4[%c0_29, %c0_30, %c0_31], %64 {strides = array<i32>} : memref<1x8x128xf32, #tpu.memory_space<vmem>>, vector<1x8x128xf32>,
      %c0_32 = arith.constant 0 : index
      %c0_33 = arith.constant 0 : index
      %66 = vector.load %arg7[%c0_32, %c0_33] : memref<8x128xf32, #tpu.memory_space<vmem>>, vector<8x128xf32>
      %67 = vector.shape_cast %66 : vector<8x128xf32> to vector<1x8x128xf32>
      %c0_34 = arith.constant 0 : index
      %c0_35 = arith.constant 0 : index
      %c0_36 = arith.constant 0 : index
      %68 = vector.load %arg5[%c0_34, %c0_35, %c0_36] : memref<1x8x128xf32, #tpu.memory_space<vmem>>, vector<1x8x128xf32>
      tpu.vector_store %arg5[%c0_34, %c0_35, %c0_36], %67 {strides = array<i32>} : memref<1x8x128xf32, #tpu.memory_space<vmem>>, vector<1x8x128xf32>,
    } else {
    }
    return
  }
  func.func @transform_0(%arg0: i32, %arg1: i32) -> (i32, i32, i32) {
    %c1_i32 = arith.constant 1 : i32
    %0 = arith.muli %arg0, %c1_i32 : i32
    %1 = arith.addi %0, %arg1 : i32
    %c0_i32 = arith.constant 0 : i32
    %c0_i32_0 = arith.constant 0 : i32
    %c0_i32_1 = arith.constant 0 : i32
    return %c0_i32, %1, %c0_i32_0 : i32, i32, i32
  }
  func.func @transform_1(%arg0: i32, %arg1: i32) -> (i32, i32) {
    %c1_i32 = arith.constant 1 : i32
    %0 = arith.muli %arg0, %c1_i32 : i32
    %1 = arith.addi %0, %arg1 : i32
    %c0_i32 = arith.constant 0 : i32
    %c0_i32_0 = arith.constant 0 : i32
    return %1, %c0_i32 : i32, i32
  }
  func.func @transform_2(%arg0: i32, %arg1: i32) -> (i32, i32, i32) {
    %c0_i32 = arith.constant 0 : i32
    %c0_i32_0 = arith.constant 0 : i32
    %c0_i32_1 = arith.constant 0 : i32
    return %arg0, %c0_i32, %c0_i32_0 : i32, i32, i32
  }
  func.func @transform_3(%arg0: i32, %arg1: i32) -> (i32, i32, i32) {
    %c0_i32 = arith.constant 0 : i32
    %c0_i32_0 = arith.constant 0 : i32
    %c0_i32_1 = arith.constant 0 : i32
    return %arg0, %c0_i32, %c0_i32_0 : i32, i32, i32
  }
}

</mosaic_0001>

<bundles_post_ra>
// kernel: class_loss.1
= control target key start
LH: loop header
LB: loop body
LE: loop exit
PB: predicated region body
PF: predicated region fallthrough
CT: control target
= control target key end

     0   :  { %s562_s12 = smov 0   ;;  %s564_s13 = smov 0   ;;  %s639_s0 = inlined_call_operand.vmem [shape: f32[3,16,128], index: 0, kind: input, shape index: {}]   ;;  %s640_s1 = inlined_call_operand.vmem [shape: s32[16,128], index: 1, kind: input, shape index: {}]   ;;  %s641_s2 = inlined_call_operand.vmem [shape: f32[2,8,128], index: 2, kind: output, shape index: {0}]   ;;  %s642_s3 = inlined_call_operand.vmem [shape: f32[2,8,128], index: 3, kind: output, shape index: {1}]  }
   0x1   :  { %s566_s14 = smov 0   ;;  %s568_s15 = smov 0  }
   0x2   :  { %s570_s16 = smov 0  }
   0x3 LB: > { %s26_s17 = sadd.s32 1, %s535_s15  ;;  %p42_p1 = scmp.ne.s32.totalorder %s527_s13, %s523_s12  ;;  %s539_s16 = sphi %s570_s16, %s14_s16   ;;  %s535_s15 = sphi %s568_s15, %s646_s15   ;;  %s531_s14 = sphi %s566_s14, %s645_s14   ;;  %s527_s13 = sphi %s564_s13, %s644_s13   ;;  %s523_s12 = sphi %s562_s12, %s643_s12  }
   0x4   : > { %p28_p0 = scmp.ge.s32.totalorder %s26_s17, 2  ;;  %p43_p2 = scmp.eq.s32.totalorder %s539_s16, 0 }
   0x5   : > { %s35_s19 = sadd.s32 1, %s527_s13  ;;  %p441_p5 = scmp.ge.s32.totalorder %s539_s16, 2 }
   0x6   : > { %s648_s17 = smov (%p28_p0, %s26_s17), 0  ;;  %p44_p3 = por %p43_p2, %p42_p1 }
   0x7   : > { %s32_s18 = ssub.s32 %s535_s15, %s648_s17  ;;  %148 = sbr.rel (%p441_p5) target bundleno = 21 (0x15), region = 16 }
   0x8   : > { %p33_p4 = scmp.eq.s32.totalorder %s32_s18, 0 }
   0xa   : > { %s597_s20 = scalar_select %p33_p4, %s527_s13, %s35_s19  }
   0xe   : > { %151 = sbr.rel (!%p44_p3) target bundleno = 21 (0x15), region = 20  ;;  %s153_s21 = sand.u32 (%p44_p3), 1, %s527_s13  }
   0xf   : > { %s442_s22 = sshll.u32 (%p44_p3), %s535_s15, 3  ;;  %s452_s23 = smul.u32 (%p44_p3), 24, %s153_s21 }
  0x10   : > { %s158_s26 = scalar_lea.vmem (%p44_p3), %s639_s0, %s442_s22 }
  0x11   : > { %v190_v0 = vld [vmem:[%s158_s26] sm:$0xff] (%p44_p3)  ;;  %v192_v1 = vld [vmem:[%s158_s26 + $0x10] sm:$0xff] (%p44_p3)  ;;  %s155_s27 = scalar_lea.vmem (%p44_p3), [#allocation4], %s452_s23 }
  0x12   : > { %v194_v2 = vld [vmem:[%s158_s26 + $0x20] sm:$0xff] (%p44_p3)  ;;  %191 = vst [vmem:[%s155_s27] sm:$0xff] (%p44_p3), %v190_v0  ;;  %193 = vst [vmem:[%s155_s27 + $0x8] sm:$0xff] (%p44_p3), %v192_v1 }
  0x13   : > { %195 = vst [vmem:[%s155_s27 + $0x10] sm:$0xff] (%p44_p3), %v194_v2 }
  0x15 PF: > { %p443_p6 = scmp.ge.s32.totalorder %s539_s16, 1  ;;  %p209_p7 = scmp.lt.s32.totalorder %s539_s16, 3 }
  0x17   : > { %p210_p8 = pnand %p443_p6, %p209_p7 }
  0x18   : > { %s216_s28 = sand.u32 (!%p210_p8), 1, %s523_s12   ;;  %p249_p9 = scmp.lt.s32.totalorder (!%p210_p8), %s531_s14, 1  ;;  %v541_v15 = vmov (!%p210_p8), 0.0  }
  0x19   : > { %213 = sbr.rel (%p210_p8) target bundleno = 78 (0x4e), region = 62 }
  0x1a   : > { %s453_s29 = smul.u32 (!%p210_p8), 24, %s216_s28 }
  0x1c   : > { %s218_s4 = scalar_lea.vmem (!%p210_p8), [#allocation4], %s453_s29 }
  0x1d   : > { %v268_v3 = vld [vmem:[%s218_s4] sm:$0xff] (!%p210_p8)  ;;  %v447_v4 = vld [vmem:[%s218_s4 + $0x8] sm:$0xff] (!%p210_p8)  ;;  %v448_v5 = vld [vmem:[%s218_s4 + $0x10] sm:$0xff] (!%p210_p8) }
  0x1e   : > { %v274_v6 = vmax.f32 (!%p210_p8), %v268_v3, %v447_v4  ;;  %v276_v7 = vmin.f32 (!%p210_p8), %v268_v3, %v447_v4  ;;  %v278_v8 = vadd.f32 (!%p210_p8), %v447_v4, %v268_v3 }
  0x20   : > { %s650_s14 = smov (!%p249_p9, %s531_s14), 1  ;;  %v275_v10 = vmax.f32 %v274_v6, %v448_v5  ;;  %v277_v11 = vmin.f32 %v276_v7, %v448_v5  ;;  %v279_v12 = vadd.f32 %v448_v5, %v278_v8 }
  0x21   : > { %s610_s30 = sshll.u32 %s650_s14, 3 }
  0x22   : > { %s252_s7 = scalar_lea.vmem %s640_s1, %s610_s30  ;;  %s261_s10 = scalar_lea.vmem %s642_s3, %s610_s30  ;;  %v280_v13 = vsub.f32 %v279_v12, %v275_v10  ;;  %v285_v14 = vsub.f32 %v277_v11, %v275_v10 }
  0x23   : > { %v273_v9 = vld [vmem:[%s252_s7] sm:$0xff]  ;;  %s257_s14 = scalar_lea.vmem %s641_s2, %s610_s30 }
  0x24   : > { %vm306_vm0 = vcmp.lt.s32.totalorder %v273_v9, 3  ;;  %v281_v17 = vsub.f32 %v280_v13, %v277_v11  ;;  %v286_v18 = vmul.f32 1.442695, %v285_v14  ;;  %vm302_vm1 = vcmp.eq.s32.totalorder %v273_v9, 2 }
  0x25   : > { %v449_v16 = vsel %vm306_vm0, 1.0, %v541_v15  ;;  %vm299_vm2 = vcmp.eq.s32.totalorder %v273_v9, 1  ;;  %v303_v29 = vsel %vm302_vm1, 4.0, %v541_v15  ;;  %vm298_vm4 = vcmp.eq.s32.totalorder %v273_v9, 0 }
  0x26   : > { %326 = vst [vmem:[%s261_s10] sm:$0xff] %v449_v16  ;;  %v282_v19 = vsub.f32 %v281_v17, %v275_v10  ;;  %495 = vpow2.f32 %v286_v18  ;;  %v300_v31 = vsel %vm299_vm2, %v447_v4, %v448_v5  ;;  %v304_v33 = vsel %vm299_vm2, 2.0, %v303_v29 }
  0x27   : > { %v301_v35 = vsel %vm298_vm4, %v268_v3, %v300_v31  ;;  %v305_v37 = vsel %vm298_vm4, 1.0, %v304_v33 }
  0x28   : > { %v283_v20 = vmul.f32 1.442695, %v282_v19 }
  0x2a   : > { %497 = vpow2.f32 %v283_v20 }
  0x30   : > { %v496_v21 = vpop.eup %495 }
  0x34   : > { %v498_v22 = vpop.eup %497 }
  0x35   : > { %v288_v23 = vadd.f32 %v498_v22, %v496_v21 }
  0x37   : > { %v289_v24 = vadd.f32 1.0, %v288_v23  ;;  %v292_v25 = vmul.f32 -0.5, %v288_v23  ;;  %v295_v27 = vand.u32 2147483647, %v288_v23 }
  0x39   : > { %499 = vlog2.f32 %v289_v24  ;;  %v293_v26 = vadd.f32 1.0, %v292_v25  ;;  %vm296_vm3 = vcmp.lt.f32.partialorder %v295_v27, 0.0004427343 }
  0x3b   : > { %v294_v28 = vmul.f32 %v293_v26, %v288_v23 }
  0x43   : > { %v500_v30 = vpop.eup %499 }
  0x44   : > { %v291_v32 = vmul.f32 0.6931472, %v500_v30 }
  0x46   : > { %v297_v34 = vsel %vm296_vm3, %v294_v28, %v291_v32 }
  0x47   : > { %v309_v36 = vadd.f32 %v297_v34, %v275_v10 }
  0x49   : > { %v310_v38 = vsub.f32 %v309_v36, %v301_v35 }
  0x4b   : > { %v312_v39 = vmul.f32 %v310_v38, %v305_v37 }
  0x4d   : > { %324 = vst [vmem:[%s257_s14] sm:$0xff] %v312_v39 }
  0x4e PF: > { %s14_s16 = sadd.s32 1, %s539_s16   ;;  %s643_s12 = smov %s527_s13 }
  0x4f   : > { %p11_p10 = scmp.ge.s32.totalorder %s14_s16, 4   ;;  %s644_s13 = smov %s597_s20 }
  0x50   : > { %s645_s14 = smov %s535_s15  ;;  %s646_s15 = smov %s648_s17 }
  0x51   :  { %13 = sbr.rel (!%p11_p10) target bundleno = 3 (0x3), region = 126 }

</bundles_post_ra>
